<compile_context>
chip_gen: v7x
topology: tpu7x:2x2x1
jax: 0.10.0
libtpu: 0.0.40
codegen_flags: <defaults>
</compile_context>

<pallas_src>
import functools

import numpy as np
import jax
import jax.numpy as jnp
from jax import lax
from jax.experimental import pallas as pl
from jax.experimental.pallas import tpu as pltpu


def _toeplitz_conv_weight(w_hwio, W):
    """HWIO (3,3,Cin,Cout) -> block-Toeplitz (3*W*Cin, W*Cout).

    Row index = (ky, x_in, cin); column index = (x_out, cout).  For a 3x3
    'SAME' (pad=1) conv on rows laid out as W*Cin lanes, an entire output row
    becomes a single matmul of the three ky-shifted input rows against this
    matrix; kx shifts and width padding are absorbed (out-of-range taps are
    left as zeros in the matrix).
    """
    KH, KW, Cin, Cout = w_hwio.shape
    w_np = np.asarray(w_hwio, np.float32)
    T = np.zeros((KH, W, Cin, W, Cout), np.float32)
    for xo in range(W):
        for kx in range(KW):
            xi = xo + kx - (KW // 2)
            if 0 <= xi < W:
                T[:, xi, :, xo, :] = w_np[:, kx, :, :]
    return T.reshape(KH * W * Cin, W * Cout)


def prepare_basic_block_params(w1, g1, be1, m1, v1, w2, g2, be2, m2, v2,
                               W, eps=1e-5):
    """One-time (hoisted) parameter prep: OIHW -> block-Toeplitz weights and
    eval-mode BatchNorm folding, tiled to the lane-dense (W*C) layout."""
    w1_hwio = np.transpose(np.asarray(w1, np.float32), (2, 3, 1, 0))
    w2_hwio = np.transpose(np.asarray(w2, np.float32), (2, 3, 1, 0))
    tw1 = jnp.asarray(_toeplitz_conv_weight(w1_hwio, W))
    tw2 = jnp.asarray(_toeplitz_conv_weight(w2_hwio, W))

    def fold(g, be, m, v):
        inv = np.asarray(g, np.float32) / np.sqrt(np.asarray(v, np.float32) + eps)
        bias = np.asarray(be, np.float32) - np.asarray(m, np.float32) * inv
        c = inv.shape[0]
        s = np.tile(inv, W).reshape(1, W * c)      # column layout: x*C + c
        b = np.tile(bias, W).reshape(1, W * c)
        return jnp.asarray(s), jnp.asarray(b)

    s1, b1 = fold(g1, be1, m1, v1)
    s2, b2 = fold(g2, be2, m2, v2)
    return (tw1, s1, b1, tw2, s2, b2)


def _make_basic_block_kernel(NB, H, W, Cin, Cout, dot_dtype):
    WCin, WCout = W * Cin, W * Cout

    def kernel(x_ref, w1_ref, s1_ref, b1_ref, w2_ref, s2_ref, b2_ref, out_ref):
        x = x_ref[...].astype(jnp.float32)                       # (NB, H, W*Cin)

        def conv(a, w_ref, wc):
            # a: (NB, H, wc) f32.  Height 'SAME' padding via zero-row concat
            # (sublane axis); width padding / kx taps live in the Toeplitz w.
            zrow = jnp.zeros((NB, 1, wc), jnp.float32)
            apad = jnp.concatenate([zrow, a, zrow], axis=1)      # (NB, H+2, wc)
            p = jnp.concatenate([apad[:, ky:ky + H, :] for ky in range(3)],
                                axis=-1)                         # (NB, H, 3*wc)
            p = p.reshape(NB * H, 3 * wc)
            return jnp.dot(p.astype(dot_dtype), w_ref[...].astype(dot_dtype),
                           preferred_element_type=jnp.float32)   # (NB*H, W*Cout)

        # ---- conv1 -> bn1 (folded) -> relu ----
        h = conv(x, w1_ref, WCin)
        h = jnp.maximum(h * s1_ref[...] + b1_ref[...], 0.0)

        # ---- conv2 -> bn2 (folded) -> + identity residual -> relu ----
        y = conv(h.reshape(NB, H, WCout), w2_ref, WCout)
        y = y * s2_ref[...] + b2_ref[...] + x.reshape(NB * H, WCin)
        out_ref[...] = jnp.maximum(y, 0.0).reshape(NB, H, WCout).astype(out_ref.dtype)

    return kernel


def basic_block_forward_nchw(x_nchw, prepared, *, batch_tile=8,
                             dot_dtype=jnp.float32):
    """BasicBlock forward (stride=1, identity shortcut).  x: (N, Cin, H, W).

    `prepared` comes from prepare_basic_block_params (hoisted, call once).
    dot_dtype may be set to jnp.bfloat16 on v6e/v7x for MXU throughput
    (f32 accumulation is kept either way).
    """
    # TODO(synk): stride>1 with a downsample shortcut module is not implemented
    # (the PyTorch default constructor path is stride=1, downsample=None).
    N, Cin, H, W = x_nchw.shape
    tw1, s1, b1, tw2, s2, b2 = prepared
    Cout = s1.shape[1] // W
    assert Cin == Cout, "identity shortcut requires inplanes == planes"
    WCin, WCout = W * Cin, W * Cout
    K1, K2 = 3 * WCin, 3 * WCout

    NB = min(batch_tile, N)
    while N % NB:
        NB -= 1
    grid = (N // NB,)

    # NCHW -> (N, H, W*C): channels fastest so the lane axis is W*C.
    x = jnp.transpose(x_nchw, (0, 2, 3, 1)).reshape(N, H, WCin)

    kernel = _make_basic_block_kernel(NB, H, W, Cin, Cout, dot_dtype)
    full = lambda n: (0, 0)

    # VMEM budget: double-buffered activation tiles + resident weights
    # + generous headroom for in-kernel intermediates.
    est = 4 * (2 * NB * H * WCin + 2 * NB * H * WCout
               + 2 * (K1 + K2) * WCout + 8 * WCout
               + 12 * NB * H * max(WCin, WCout))
    vmem_limit = int(min(max(4 * est, 32 << 20), 100 << 20))

    out = pl.pallas_call(
        kernel,
        out_shape=jax.ShapeDtypeStruct((N, H, WCout), x_nchw.dtype),
        grid=grid,
        in_specs=[
            pl.BlockSpec((NB, H, WCin), lambda n: (n, 0, 0)),   # x tile
            pl.BlockSpec((K1, WCout), full),                    # toeplitz w1
            pl.BlockSpec((1, WCout), full),                     # bn1 scale
            pl.BlockSpec((1, WCout), full),                     # bn1 bias
            pl.BlockSpec((K2, WCout), full),                    # toeplitz w2
            pl.BlockSpec((1, WCout), full),                     # bn2 scale
            pl.BlockSpec((1, WCout), full),                     # bn2 bias
        ],
        out_specs=pl.BlockSpec((NB, H, WCout), lambda n: (n, 0, 0)),
        compiler_params=pltpu.CompilerParams(
            dimension_semantics=("parallel",),
            vmem_limit_bytes=vmem_limit),
    )(x, tw1, s1, b1, tw2, s2, b2)

    # (N, H, W*C) -> NCHW
    return jnp.transpose(out.reshape(N, H, W, Cout), (0, 3, 1, 2))


def basic_block_reference(x_nchw, w1, g1, be1, m1, v1, w2, g2, be2, m2, v2,
                          eps=1e-5):
    """Pure-JAX reference (lax conv) used to validate the kernel."""
    x = jnp.transpose(x_nchw, (0, 2, 3, 1))
    w1_hwio = jnp.transpose(w1, (2, 3, 1, 0))
    w2_hwio = jnp.transpose(w2, (2, 3, 1, 0))
    dn = ('NHWC', 'HWIO', 'NHWC')

    def bn(y, g, be, m, v):
        return (y - m) / jnp.sqrt(v + eps) * g + be

    h = lax.conv_general_dilated(x, w1_hwio, (1, 1), 'SAME', dimension_numbers=dn)
    h = jax.nn.relu(bn(h, g1, be1, m1, v1))
    h = lax.conv_general_dilated(h, w2_hwio, (1, 1), 'SAME', dimension_numbers=dn)
    h = bn(h, g2, be2, m2, v2) + x
    return jnp.transpose(jax.nn.relu(h), (0, 3, 1, 2))


if __name__ == "__main__":
    key = jax.random.PRNGKey(0)
    N, C, H, W = 2, 8, 16, 16            # inplanes == planes == 8, stride 1
    ks = jax.random.split(key, 11)

    x = jax.random.normal(ks[0], (N, C, H, W), jnp.float32)
    w1 = jax.random.normal(ks[1], (C, C, 3, 3), jnp.float32) * 0.1
    w2 = jax.random.normal(ks[2], (C, C, 3, 3), jnp.float32) * 0.1
    g1 = 1.0 + 0.1 * jax.random.normal(ks[3], (C,), jnp.float32)
    be1 = 0.1 * jax.random.normal(ks[4], (C,), jnp.float32)
    m1 = 0.1 * jax.random.normal(ks[5], (C,), jnp.float32)
    v1 = 1.0 + 0.1 * jax.random.uniform(ks[6], (C,), jnp.float32)
    g2 = 1.0 + 0.1 * jax.random.normal(ks[7], (C,), jnp.float32)
    be2 = 0.1 * jax.random.normal(ks[8], (C,), jnp.float32)
    m2 = 0.1 * jax.random.normal(ks[9], (C,), jnp.float32)
    v2 = 1.0 + 0.1 * jax.random.uniform(ks[10], (C,), jnp.float32)

    # One-time (hoisted) weight / BN preparation.
    prepared = prepare_basic_block_params(w1, g1, be1, m1, v1,
                                          w2, g2, be2, m2, v2, W=W)

    fwd = jax.jit(functools.partial(basic_block_forward_nchw, batch_tile=2))
    out = jax.block_until_ready(fwd(x, prepared))

    ref = jax.block_until_ready(
        basic_block_reference(x, w1, g1, be1, m1, v1, w2, g2, be2, m2, v2))

    assert out.shape == (N, C, H, W)
    err = float(jnp.max(jnp.abs(out - ref)))
    assert err < 2e-4, f"kernel mismatch vs reference: {err}"
    print("KERNEL_OK")
</pallas_src>

<mosaic_0001>
module attributes {stable_mosaic.version = 11 : i64} {
  func.func @kernel(%arg0: i32, %arg1: memref<2x16x128xf32, #tpu.memory_space<vmem>>, %arg2: memref<384x128xf32, #tpu.memory_space<vmem>>, %arg3: memref<1x128xf32, #tpu.memory_space<vmem>>, %arg4: memref<1x128xf32, #tpu.memory_space<vmem>>, %arg5: memref<384x128xf32, #tpu.memory_space<vmem>>, %arg6: memref<1x128xf32, #tpu.memory_space<vmem>>, %arg7: memref<1x128xf32, #tpu.memory_space<vmem>>, %arg8: memref<2x16x128xf32, #tpu.memory_space<vmem>>) attributes {dimension_semantics = [#tpu.dimension_semantics<parallel>], iteration_bounds = array<i64: 1>, scalar_prefetch = 0 : i64, scratch_operands = 0 : i64, tpu.core_type = #tpu.core_type<tc>, window_params = [{transform_indices = @transform_0, window_bounds = array<i64: 2, 16, 128>}, {pipeline_mode = #tpu.pipeline_mode<synchronous>, transform_indices = @transform_1, window_bounds = array<i64: 384, 128>}, {pipeline_mode = #tpu.pipeline_mode<synchronous>, transform_indices = @transform_2, window_bounds = array<i64: 1, 128>}, {pipeline_mode = #tpu.pipeline_mode<synchronous>, transform_indices = @transform_3, window_bounds = array<i64: 1, 128>}, {pipeline_mode = #tpu.pipeline_mode<synchronous>, transform_indices = @transform_4, window_bounds = array<i64: 384, 128>}, {pipeline_mode = #tpu.pipeline_mode<synchronous>, transform_indices = @transform_5, window_bounds = array<i64: 1, 128>}, {pipeline_mode = #tpu.pipeline_mode<synchronous>, transform_indices = @transform_6, window_bounds = array<i64: 1, 128>}, {transform_indices = @transform_7, window_bounds = array<i64: 2, 16, 128>}]} {
    %c0 = arith.constant 0 : index
    %c0_0 = arith.constant 0 : index
    %c0_1 = arith.constant 0 : index
    %0 = vector.load %arg1[%c0, %c0_0, %c0_1] : memref<2x16x128xf32, #tpu.memory_space<vmem>>, vector<2x16x128xf32>
    %cst = arith.constant 0.000000e+00 : f32
    %1 = vector.broadcast %cst : f32 to vector<2x1x128xf32>
    %2 = tpu.concatenate %1, %0, %1 in 1 : vector<2x1x128xf32>, vector<2x16x128xf32>, vector<2x1x128xf32> -> vector<2x18x128xf32>
    %3 = vector.extract_strided_slice %2 {offsets = [0, 0, 0], sizes = [2, 16, 128], strides = [1, 1, 1]} : vector<2x18x128xf32> to vector<2x16x128xf32>
    %4 = vector.extract_strided_slice %2 {offsets = [0, 1, 0], sizes = [2, 16, 128], strides = [1, 1, 1]} : vector<2x18x128xf32> to vector<2x16x128xf32>
    %5 = vector.extract_strided_slice %2 {offsets = [0, 2, 0], sizes = [2, 16, 128], strides = [1, 1, 1]} : vector<2x18x128xf32> to vector<2x16x128xf32>
    %6 = tpu.concatenate %3, %4, %5 in 2 : vector<2x16x128xf32>, vector<2x16x128xf32>, vector<2x16x128xf32> -> vector<2x16x384xf32>
    %7 = vector.shape_cast %6 : vector<2x16x384xf32> to vector<32x384xf32>
    %c0_2 = arith.constant 0 : index
    %c0_3 = arith.constant 0 : index
    %8 = vector.load %arg2[%c0_2, %c0_3] : memref<384x128xf32, #tpu.memory_space<vmem>>, vector<384x128xf32>
    %cst_4 = arith.constant dense<0.000000e+00> : vector<32x128xf32>
    %9 = tpu.matmul %7, %8, %cst_4 {dimension_numbers = #tpu.dot_dimension_numbers<[1], [0], [0], [1], [0, 0, 1, 1], [], []>} : vector<32x384xf32>, vector<384x128xf32>, vector<32x128xf32> -> vector<32x128xf32>
    %c0_5 = arith.constant 0 : index
    %c0_6 = arith.constant 0 : index
    %10 = vector.load %arg3[%c0_5, %c0_6] : memref<1x128xf32, #tpu.memory_space<vmem>>, vector<1x128xf32>
    %11 = vector.broadcast %10 : vector<1x128xf32> to vector<32x128xf32>
    %12 = arith.mulf %9, %11 : vector<32x128xf32>
    %c0_7 = arith.constant 0 : index
    %c0_8 = arith.constant 0 : index
    %13 = vector.load %arg4[%c0_7, %c0_8] : memref<1x128xf32, #tpu.memory_space<vmem>>, vector<1x128xf32>
    %14 = vector.broadcast %13 : vector<1x128xf32> to vector<32x128xf32>
    %15 = arith.addf %12, %14 : vector<32x128xf32>
    %cst_9 = arith.constant 0.000000e+00 : f32
    %16 = vector.broadcast %cst_9 : f32 to vector<32x128xf32>
    %17 = arith.maximumf %15, %16 : vector<32x128xf32>
    %18 = vector.shape_cast %17 : vector<32x128xf32> to vector<2x16x128xf32>
    %cst_10 = arith.constant 0.000000e+00 : f32
    %19 = vector.broadcast %cst_10 : f32 to vector<2x1x128xf32>
    %20 = tpu.concatenate %19, %18, %19 in 1 : vector<2x1x128xf32>, vector<2x16x128xf32>, vector<2x1x128xf32> -> vector<2x18x128xf32>
    %21 = vector.extract_strided_slice %20 {offsets = [0, 0, 0], sizes = [2, 16, 128], strides = [1, 1, 1]} : vector<2x18x128xf32> to vector<2x16x128xf32>
    %22 = vector.extract_strided_slice %20 {offsets = [0, 1, 0], sizes = [2, 16, 128], strides = [1, 1, 1]} : vector<2x18x128xf32> to vector<2x16x128xf32>
    %23 = vector.extract_strided_slice %20 {offsets = [0, 2, 0], sizes = [2, 16, 128], strides = [1, 1, 1]} : vector<2x18x128xf32> to vector<2x16x128xf32>
    %24 = tpu.concatenate %21, %22, %23 in 2 : vector<2x16x128xf32>, vector<2x16x128xf32>, vector<2x16x128xf32> -> vector<2x16x384xf32>
    %25 = vector.shape_cast %24 : vector<2x16x384xf32> to vector<32x384xf32>
    %c0_11 = arith.constant 0 : index
    %c0_12 = arith.constant 0 : index
    %26 = vector.load %arg5[%c0_11, %c0_12] : memref<384x128xf32, #tpu.memory_space<vmem>>, vector<384x128xf32>
    %cst_13 = arith.constant dense<0.000000e+00> : vector<32x128xf32>
    %27 = tpu.matmul %25, %26, %cst_13 {dimension_numbers = #tpu.dot_dimension_numbers<[1], [0], [0], [1], [0, 0, 1, 1], [], []>} : vector<32x384xf32>, vector<384x128xf32>, vector<32x128xf32> -> vector<32x128xf32>
    %c0_14 = arith.constant 0 : index
    %c0_15 = arith.constant 0 : index
    %28 = vector.load %arg6[%c0_14, %c0_15] : memref<1x128xf32, #tpu.memory_space<vmem>>, vector<1x128xf32>
    %29 = vector.broadcast %28 : vector<1x128xf32> to vector<32x128xf32>
    %30 = arith.mulf %27, %29 : vector<32x128xf32>
    %c0_16 = arith.constant 0 : index
    %c0_17 = arith.constant 0 : index
    %31 = vector.load %arg7[%c0_16, %c0_17] : memref<1x128xf32, #tpu.memory_space<vmem>>, vector<1x128xf32>
    %32 = vector.broadcast %31 : vector<1x128xf32> to vector<32x128xf32>
    %33 = arith.addf %30, %32 : vector<32x128xf32>
    %34 = vector.shape_cast %0 : vector<2x16x128xf32> to vector<32x128xf32>
    %35 = arith.addf %33, %34 : vector<32x128xf32>
    %cst_18 = arith.constant 0.000000e+00 : f32
    %36 = vector.broadcast %cst_18 : f32 to vector<32x128xf32>
    %37 = arith.maximumf %35, %36 : vector<32x128xf32>
    %38 = vector.shape_cast %37 : vector<32x128xf32> to vector<2x16x128xf32>
    %c0_19 = arith.constant 0 : index
    %c0_20 = arith.constant 0 : index
    %c0_21 = arith.constant 0 : index
    %39 = vector.load %arg8[%c0_19, %c0_20, %c0_21] : memref<2x16x128xf32, #tpu.memory_space<vmem>>, vector<2x16x128xf32>
    tpu.vector_store %arg8[%c0_19, %c0_20, %c0_21], %38 {strides = array<i32>} : memref<2x16x128xf32, #tpu.memory_space<vmem>>, vector<2x16x128xf32>,
    return
  }
  func.func @transform_0(%arg0: i32) -> (i32, i32, i32) {
    %c0_i32 = arith.constant 0 : i32
    %c0_i32_0 = arith.constant 0 : i32
    %c0_i32_1 = arith.constant 0 : i32
    return %arg0, %c0_i32, %c0_i32_0 : i32, i32, i32
  }
  func.func @transform_1(%arg0: i32) -> (i32, i32) {
    %c0_i32 = arith.constant 0 : i32
    %c0_i32_0 = arith.constant 0 : i32
    %c0_i32_1 = arith.constant 0 : i32
    return %c0_i32, %c0_i32_0 : i32, i32
  }
  func.func @transform_2(%arg0: i32) -> (i32, i32) {
    %c0_i32 = arith.constant 0 : i32
    %c0_i32_0 = arith.constant 0 : i32
    %c0_i32_1 = arith.constant 0 : i32
    return %c0_i32, %c0_i32_0 : i32, i32
  }
  func.func @transform_3(%arg0: i32) -> (i32, i32) {
    %c0_i32 = arith.constant 0 : i32
    %c0_i32_0 = arith.constant 0 : i32
    %c0_i32_1 = arith.constant 0 : i32
    return %c0_i32, %c0_i32_0 : i32, i32
  }
  func.func @transform_4(%arg0: i32) -> (i32, i32) {
    %c0_i32 = arith.constant 0 : i32
    %c0_i32_0 = arith.constant 0 : i32
    %c0_i32_1 = arith.constant 0 : i32
    return %c0_i32, %c0_i32_0 : i32, i32
  }
  func.func @transform_5(%arg0: i32) -> (i32, i32) {
    %c0_i32 = arith.constant 0 : i32
    %c0_i32_0 = arith.constant 0 : i32
    %c0_i32_1 = arith.constant 0 : i32
    return %c0_i32, %c0_i32_0 : i32, i32
  }
  func.func @transform_6(%arg0: i32) -> (i32, i32) {
    %c0_i32 = arith.constant 0 : i32
    %c0_i32_0 = arith.constant 0 : i32
    %c0_i32_1 = arith.constant 0 : i32
    return %c0_i32, %c0_i32_0 : i32, i32
  }
  func.func @transform_7(%arg0: i32) -> (i32, i32, i32) {
    %c0_i32 = arith.constant 0 : i32
    %c0_i32_0 = arith.constant 0 : i32
    %c0_i32_1 = arith.constant 0 : i32
    return %arg0, %c0_i32, %c0_i32_0 : i32, i32, i32
  }
}

</mosaic_0001>

<bundles_post_ra>
// kernel: basic_block_forward_nchw.1
= control target key start
LH: loop header
LB: loop body
LE: loop exit
PB: predicated region body
PF: predicated region fallthrough
CT: control target
= control target key end

     0   :  { %vm34_vm0 = vcmask 1040384   ;;  %vm55_vm1 = vcmask 1046528   ;;  %vm70_vm2 = vcmask 1045504   ;;  %s1421_s1 = inlined_call_operand.vmem [shape: f32[384,128], index: 1, kind: input, shape index: {}]   ;;  %s1422_s0 = inlined_call_operand.vmem [shape: f32[2,16,128], index: 0, kind: input, shape index: {}]   ;;  %s1423_s4 = inlined_call_operand.vmem [shape: f32[384,128], index: 4, kind: input, shape index: {}]   ;;  %s1424_s2 = inlined_call_operand.vmem [shape: f32[1,128], index: 2, kind: input, shape index: {}]   ;;  %s1425_s3 = inlined_call_operand.vmem [shape: f32[1,128], index: 3, kind: input, shape index: {}]   ;;  %s1426_s5 = inlined_call_operand.vmem [shape: f32[1,128], index: 5, kind: input, shape index: {}]   ;;  %s1427_s6 = inlined_call_operand.vmem [shape: f32[1,128], index: 6, kind: input, shape index: {}]   ;;  %s1428_s7 = inlined_call_operand.vmem [shape: f32[2,16,128], index: 7, kind: output, shape index: {}]  }
   0x1   :  { %v101_v0 = vld [vmem:[%s1421_s1 + $0x80] sm:$0xff]  ;;  %v102_v1 = vld [vmem:[%s1421_s1 + $0x88] sm:$0xff]  ;;  %v103_v9 = vld [vmem:[%s1421_s1 + $0x90] sm:$0xff] }
   0x2   :  { %v85_v2 = vld [vmem:[%s1421_s1] sm:$0xff]  ;;  %v853_v3 = vpack.c.bf16 %v102_v1, %v101_v0  ;;  %v86_v4 = vld [vmem:[%s1421_s1 + $0x8] sm:$0xff]  ;;  %v104_v10 = vld [vmem:[%s1421_s1 + $0x98] sm:$0xff] }
   0x3   :  { %v117_v5 = vld [vmem:[%s1421_s1 + $0x100] sm:$0xff]  ;;  %v118_v6 = vld [vmem:[%s1421_s1 + $0x108] sm:$0xff]  ;;  %v855_v7 = vpack.c.bf16 %v86_v4, %v85_v2  ;;  %v87_v11 = vld [vmem:[%s1421_s1 + $0x10] sm:$0xff]  ;;  %v857_v12 = vpack.c.bf16 %v104_v10, %v103_v9 }
   0x4   :  { %v885_v8 = vpack.c.bf16 %v118_v6, %v117_v5  ;;  %854 = vmatprep.subr.bf16.mxu0 %v853_v3  ;;  %v88_v13 = vld [vmem:[%s1421_s1 + $0x18] sm:$0xff]  ;;  %v119_v14 = vld [vmem:[%s1421_s1 + $0x110] sm:$0xff]  ;;  %v105_v18 = vld [vmem:[%s1421_s1 + $0xa0] sm:$0xff] }
   0x5   :  { %v120_v15 = vld [vmem:[%s1421_s1 + $0x118] sm:$0xff]  ;;  %856 = vmatpush3.bf16.msra.mxu0 %v855_v7  ;;  %v859_v16 = vpack.c.bf16 %v88_v13, %v87_v11  ;;  %v106_v19 = vld [vmem:[%s1421_s1 + $0xa8] sm:$0xff]  ;;  %v89_v20 = vld [vmem:[%s1421_s1 + $0x20] sm:$0xff] }
   0x6   :  { %886 = vmatprep.subr.bf16.mxu1 %v885_v8  ;;  %v889_v17 = vpack.c.bf16 %v120_v15, %v119_v14  ;;  %858 = vmatprep.subr.bf16.mxu0 %v857_v12  ;;  %v861_v21 = vpack.c.bf16 %v106_v19, %v105_v18  ;;  %v90_v22 = vld [vmem:[%s1421_s1 + $0x28] sm:$0xff]  ;;  %v121_v23 = vld [vmem:[%s1421_s1 + $0x120] sm:$0xff]  ;;  %v107_v26 = vld [vmem:[%s1421_s1 + $0xb0] sm:$0xff] }
   0x7   :  { %888 = vmatpush3.bf16.msra.mxu1 %v885_v8  ;;  %v122_v24 = vld [vmem:[%s1421_s1 + $0x128] sm:$0xff]  ;;  %v108_v27 = vld [vmem:[%s1421_s1 + $0xb8] sm:$0xff]  ;;  %v123_v28 = vld [vmem:[%s1421_s1 + $0x130] sm:$0xff]  ;;  %v863_v30 = vpack.c.bf16 %v90_v22, %v89_v20 }
   0x8   :  { %890 = vmatprep.subr.bf16.mxu1 %v889_v17  ;;  %v893_v25 = vpack.c.bf16 %v122_v24, %v121_v23  ;;  %v124_v29 = vld [vmem:[%s1421_s1 + $0x138] sm:$0xff]  ;;  %v865_v31 = vpack.c.bf16 %v108_v27, %v107_v26  ;;  %v91_v32 = vld [vmem:[%s1421_s1 + $0x30] sm:$0xff]  ;;  %v109_v35 = vld [vmem:[%s1421_s1 + $0xc0] sm:$0xff] }
   0x9   :  { %860 = vmatpush3.bf16.msra.mxu0 %v859_v16  ;;  %v92_v33 = vld [vmem:[%s1421_s1 + $0x38] sm:$0xff]  ;;  %v897_v34 = vpack.c.bf16 %v124_v29, %v123_v28  ;;  %v110_v36 = vld [vmem:[%s1421_s1 + $0xc8] sm:$0xff]  ;;  %v125_v37 = vld [vmem:[%s1421_s1 + $0x140] sm:$0xff] }
   0xa   :  { %862 = vmatprep.subr.bf16.mxu0 %v861_v21  ;;  %v126_v38 = vld [vmem:[%s1421_s1 + $0x148] sm:$0xff]  ;;  %v867_v39 = vpack.c.bf16 %v92_v33, %v91_v32  ;;  %v869_v40 = vpack.c.bf16 %v110_v36, %v109_v35  ;;  %v93_v41 = vld [vmem:[%s1421_s1 + $0x40] sm:$0xff]  ;;  %v111_v44 = vld [vmem:[%s1421_s1 + $0xd0] sm:$0xff] }
   0xb   :  { %892 = vmatpush3.bf16.msra.mxu1 %v889_v17  ;;  %v94_v42 = vld [vmem:[%s1421_s1 + $0x48] sm:$0xff]  ;;  %v901_v43 = vpack.c.bf16 %v126_v38, %v125_v37  ;;  %v112_v45 = vld [vmem:[%s1421_s1 + $0xd8] sm:$0xff]  ;;  %v95_v46 = vld [vmem:[%s1421_s1 + $0x50] sm:$0xff] }
   0xc   :  { %894 = vmatprep.subr.bf16.mxu1 %v893_v25  ;;  %v127_v47 = vld [vmem:[%s1421_s1 + $0x150] sm:$0xff]  ;;  %v128_v48 = vld [vmem:[%s1421_s1 + $0x158] sm:$0xff]  ;;  %v871_v49 = vpack.c.bf16 %v94_v42, %v93_v41  ;;  %v1132_v51 = vld [vmem:[%s1422_s0] sm:$0xff]  ;;  %v873_v53 = vpack.c.bf16 %v112_v45, %v111_v44 }
   0xd   :  { %864 = vmatpush3.bf16.msra.mxu0 %v863_v30  ;;  %v96_v50 = vld [vmem:[%s1421_s1 + $0x58] sm:$0xff]  ;;  %v1137_v52 = vld [vmem:[%s1422_s0 + $0x8] sm:$0xff]  ;;  %v1140_v54 = vrot.slane %v1132_v51, 7  ;;  %v905_v56 = vpack.c.bf16 %v128_v48, %v127_v47  ;;  %v113_v57 = vld [vmem:[%s1421_s1 + $0xe0] sm:$0xff] }
   0xe   :  { %866 = vmatprep.subr.bf16.mxu0 %v865_v31  ;;  %v36_v55 = vrot.slane %v1137_v52, 7  ;;  %v114_v58 = vld [vmem:[%s1421_s1 + $0xe8] sm:$0xff]  ;;  %v875_v59 = vpack.c.bf16 %v96_v50, %v95_v46  ;;  %v129_v60 = vld [vmem:[%s1421_s1 + $0x160] sm:$0xff]  ;;  %v115_v7 = vld [vmem:[%s1421_s1 + $0xf0] sm:$0xff] }
   0xf   :  { %896 = vmatpush3.bf16.msra.mxu1 %v893_v25  ;;  %v130_v61 = vld [vmem:[%s1421_s1 + $0x168] sm:$0xff]  ;;  %v47_v63 = vsel %vm34_vm0, 0.0, %v1140_v54  ;;  %v877_v4 = vpack.c.bf16 %v114_v58, %v113_v57  ;;  %v97_v5 = vld [vmem:[%s1421_s1 + $0x60] sm:$0xff]  ;;  %v116_v9 = vld [vmem:[%s1421_s1 + $0xf8] sm:$0xff] }
  0x10   :  { %898 = vmatprep.subr.bf16.mxu1 %v897_v34  ;;  %v1157_v62 = vsel %vm34_vm0, %v1140_v54, %v36_v55  ;;  %v56_v0 = vrot.slane %v47_v63, 1  ;;  %v71_v2 = vrot.slane %v47_v63, 2  ;;  %v98_v6 = vld [vmem:[%s1421_s1 + $0x68] sm:$0xff]  ;;  %v909_v8 = vpack.c.bf16 %v130_v61, %v129_v60  ;;  %v1182_v12 = vld [vmem:[%s1422_s0 + $0x10] sm:$0xff]  ;;  %v1187_v13 = vld [vmem:[%s1422_s0 + $0x18] sm:$0xff] }
  0x11   :  { %868 = vmatpush3.bf16.msra.mxu0 %v867_v39  ;;  %v57_v1 = vrot.slane %v1157_v62, 1  ;;  %v72_v3 = vrot.slane %v1157_v62, 2  ;;  %v131_v14 = vld [vmem:[%s1421_s1 + $0x170] sm:$0xff]  ;;  %v132_v15 = vld [vmem:[%s1421_s1 + $0x178] sm:$0xff]  ;;  %v879_v16 = vpack.c.bf16 %v98_v6, %v97_v5  ;;  %v881_v18 = vpack.c.bf16 %v116_v9, %v115_v7  ;;  %v397_v22 = vld [vmem:[%s1423_s4 + $0x80] sm:$0xff] }
  0x12   :  { %870 = vmatprep.subr.bf16.mxu0 %v869_v40  ;;  %v99_v17 = vld [vmem:[%s1421_s1 + $0x70] sm:$0xff]  ;;  %v100_v19 = vld [vmem:[%s1421_s1 + $0x78] sm:$0xff]  ;;  %v1202_v20 = vrot.slane %v1182_v12, 7  ;;  %v39_v21 = vrot.slane %v1187_v13, 7  ;;  %v398_v23 = vld [vmem:[%s1423_s4 + $0x88] sm:$0xff]  ;;  %v913_v24 = vpack.c.bf16 %v132_v15, %v131_v14  ;;  %v49_v25 = vsel %vm34_vm0, %v36_v55, 0.0 }
  0x13   :  { %900 = vmatpush3.bf16.msra.mxu1 %v897_v34  ;;  %v58_v10 = vsel %vm55_vm1, %v56_v0, %v57_v1  ;;  %v73_v11 = vsel %vm70_vm2, %v71_v2, %v72_v3  ;;  %v413_v26 = vld [vmem:[%s1423_s4 + $0x100] sm:$0xff]  ;;  %v414_v27 = vld [vmem:[%s1423_s4 + $0x108] sm:$0xff]  ;;  %v883_v28 = vpack.c.bf16 %v100_v19, %v99_v17  ;;  %v917_v29 = vpack.c.bf16 %v398_v23, %v397_v22  ;;  %v399_v40 = vld [vmem:[%s1423_s4 + $0x90] sm:$0xff] }
  0x14   :  { %902 = vmatprep.subr.bf16.mxu1 %v901_v43  ;;  %197 = vmatprep.mubr.f32.mxu0 %v58_v10  ;;  %v74_v30 = vrot.slane %v49_v25, 2  ;;  %v59_v31 = vrot.slane %v49_v25, 1  ;;  %v40_v32 = vsel %vm34_vm0, %v1202_v20, %v39_v21  ;;  %v48_v33 = vsel %vm34_vm0, 0.0, %v1202_v20  ;;  %v381_v38 = vld [vmem:[%s1423_s4] sm:$0xff]  ;;  %v382_v39 = vld [vmem:[%s1423_s4 + $0x8] sm:$0xff]  ;;  %v400_v41 = vld [vmem:[%s1423_s4 + $0x98] sm:$0xff] }
  0x15   :  { %872 = vmatpush3.bf16.msra.mxu0 %v871_v49  ;;  %809 = vmatprep.mubr.f32.mxu1 %v73_v11  ;;  %v76_v34 = vrot.slane %v48_v33, 2  ;;  %v77_v35 = vrot.slane %v40_v32, 2  ;;  %v50_v36 = vsel %vm34_vm0, %v39_v21, 0.0  ;;  %v949_v37 = vpack.c.bf16 %v414_v27, %v413_v26  ;;  %vm1236_vm3 = vmneg %vm34_vm0  ;;  %v415_v45 = vld [vmem:[%s1423_s4 + $0x110] sm:$0xff]  ;;  %v416_v46 = vld [vmem:[%s1423_s4 + $0x118] sm:$0xff] }
  0x16   :  { %874 = vmatprep.subr.bf16.mxu0 %v873_v53  ;;  %v62_v44 = vrot.slane %v40_v32, 1  ;;  %v75_v47 = vsel %vm70_vm2, %v72_v3, %v74_v30  ;;  %v60_v48 = vsel %vm55_vm1, %v57_v1, %v59_v31  ;;  %v79_v49 = vrot.slane %v50_v36, 2  ;;  %v384_v57 = vld [vmem:[%s1423_s4 + $0x18] sm:$0xff]  ;;  %v402_v60 = vld [vmem:[%s1423_s4 + $0xa8] sm:$0xff]  ;;  %v417_v61 = vld [vmem:[%s1423_s4 + $0x120] sm:$0xff] }
  0x17   :  { %904 = vmatpush3.bf16.msra.mxu1 %v901_v43  ;;  %v61_v43 = vrot.slane %v48_v33, 1  ;;  %v919_v50 = vpack.c.bf16 %v382_v39, %v381_v38  ;;  %v78_v53 = vsel %vm70_vm2, %v76_v34, %v77_v35  ;;  %v921_v55 = vpack.c.bf16 %v400_v41, %v399_v40  ;;  %v418_v63 = vld [vmem:[%s1423_s4 + $0x128] sm:$0xff]  ;;  %v404_v9 = vld [vmem:[%s1423_s4 + $0xb8] sm:$0xff]  ;;  %v419_v10 = vld [vmem:[%s1423_s4 + $0x130] sm:$0xff] }
  0x18   :  { %906 = vmatprep.subr.bf16.mxu1 %v905_v56  ;;  %v953_v58 = vpack.c.bf16 %v416_v46, %v415_v45  ;;  %v80_v0 = vsel %vm70_vm2, %v77_v35, %v79_v49  ;;  %v64_v1 = vrot.slane %v50_v36, 1  ;;  %v386_v6 = vld [vmem:[%s1423_s4 + $0x28] sm:$0xff]  ;;  %v420_v14 = vld [vmem:[%s1423_s4 + $0x138] sm:$0xff]  ;;  %v387_v15 = vld [vmem:[%s1423_s4 + $0x30] sm:$0xff] }
  0x19   :  { %876 = vmatpush3.bf16.msra.mxu0 %v875_v59  ;;  %v401_v59 = vld [vmem:[%s1423_s4 + $0xa0] sm:$0xff]  ;;  %v961_v17 = vpack.c.bf16 %v420_v14, %v419_v10  ;;  %v422_v23 = vld [vmem:[%s1423_s4 + $0x148] sm:$0xff]  ;;  %v423_v30 = vld [vmem:[%s1423_s4 + $0x150] sm:$0xff] }
  0x1a   :  { %878 = vmatprep.subr.bf16.mxu0 %v877_v4  ;;  %v925_v3 = vpack.c.bf16 %v402_v60, %v401_v59  ;;  %v957_v4 = vpack.c.bf16 %v418_v63, %v417_v61  ;;  %v65_v5 = vsel %vm55_vm1, %v62_v44, %v64_v1  ;;  %v405_v19 = vld [vmem:[%s1423_s4 + $0xc0] sm:$0xff]  ;;  %v390_v26 = vld [vmem:[%s1423_s4 + $0x48] sm:$0xff]  ;;  %v391_v33 = vld [vmem:[%s1423_s4 + $0x50] sm:$0xff] }
  0x1b   :  { %908 = vmatpush3.bf16.msra.mxu1 %v905_v56  ;;  %v383_v56 = vld [vmem:[%s1423_s4 + $0x10] sm:$0xff]  ;;  %v421_v22 = vld [vmem:[%s1423_s4 + $0x140] sm:$0xff]  ;;  %v392_v34 = vld [vmem:[%s1423_s4 + $0x58] sm:$0xff] }
  0x1c   :  { %910 = vmatprep.subr.bf16.mxu1 %v909_v8  ;;  %v923_v2 = vpack.c.bf16 %v384_v57, %v383_v56  ;;  %v965_v25 = vpack.c.bf16 %v422_v23, %v421_v22  ;;  %v939_v36 = vpack.c.bf16 %v392_v34, %v391_v33  ;;  %v410_v38 = vld [vmem:[%s1423_s4 + $0xe8] sm:$0xff]  ;;  %v425_v39 = vld [vmem:[%s1423_s4 + $0x160] sm:$0xff]  ;;  %v427_v49 = vld [vmem:[%s1423_s4 + $0x170] sm:$0xff] }
  0x1d   :  { %880 = vmatpush3.bf16.msra.mxu0 %v879_v16  ;;  %v388_v16 = vld [vmem:[%s1423_s4 + $0x38] sm:$0xff]  ;;  %v426_v41 = vld [vmem:[%s1423_s4 + $0x168] sm:$0xff] }
  0x1e   :  { %882 = vmatprep.subr.bf16.mxu0 %v881_v18  ;;  %v931_v18 = vpack.c.bf16 %v388_v16, %v387_v15  ;;  %v973_v45 = vpack.c.bf16 %v426_v41, %v425_v39  ;;  %v396_v56 = vld [vmem:[%s1423_s4 + $0x78] sm:$0xff] }
  0x1f   :  { %912 = vmatpush3.bf16.msra.mxu1 %v909_v8  ;;  %v403_v8 = vld [vmem:[%s1423_s4 + $0xb0] sm:$0xff] }
  0x20   :  { %914 = vmatprep.subr.bf16.mxu1 %v913_v24  ;;  %v929_v11 = vpack.c.bf16 %v404_v9, %v403_v8 }
  0x21   :  { %884 = vmatpush3.bf16.msra.mxu0 %v883_v28  ;;  %v407_v28 = vld [vmem:[%s1423_s4 + $0xd0] sm:$0xff] }
  0x22   :  { %918 = vmatprep.subr.bf16.mxu0 %v917_v29  ;;  %v408_v29 = vld [vmem:[%s1423_s4 + $0xd8] sm:$0xff] }
  0x23   :  { %916 = vmatpush3.bf16.msra.mxu1 %v913_v24  ;;  %v389_v24 = vld [vmem:[%s1423_s4 + $0x40] sm:$0xff]  ;;  %v937_v31 = vpack.c.bf16 %v408_v29, %v407_v28 }
  0x24   :  { %950 = vmatprep.subr.bf16.mxu1 %v949_v37  ;;  %638 = vmatmul.mubr.msk.f32.vlgmr.msra.gmra.mrb[0].mxu0 %vm1236_vm3, %v1140_v54  ;;  %v63_v54 = vsel %vm55_vm1, %v61_v43, %v62_v44  ;;  %v935_v27 = vpack.c.bf16 %v390_v26, %v389_v24  ;;  %v393_v43 = vld [vmem:[%s1423_s4 + $0x60] sm:$0xff]  ;;  %v394_v44 = vld [vmem:[%s1423_s4 + $0x68] sm:$0xff] }
  0x25   :  { %202 = vmatprep.mubr.f32.mxu0 %v60_v48  ;;  %920 = vmatpush3.bf16.msra.mxu0 %v919_v50  ;;  %v943_v46 = vpack.c.bf16 %v394_v44, %v393_v43  ;;  %v412_v48 = vld [vmem:[%s1423_s4 + $0xf8] sm:$0xff] }
  0x26   :  { %810 = vmatmul.mubr.f32.vlgmr.msra.gmra.mrb[0].mxu1 %v75_v47  ;;  %922 = vmatprep.subr.bf16.mxu0 %v921_v55  ;;  %v411_v47 = vld [vmem:[%s1423_s4 + $0xf0] sm:$0xff] }
  0x27   :  { %812 = vmatprep.mubr.f32.mxu1 %v78_v53  ;;  %952 = vmatpush3.bf16.msra.mxu1 %v949_v37  ;;  %v409_v37 = vld [vmem:[%s1423_s4 + $0xe0] sm:$0xff]  ;;  %v945_v50 = vpack.c.bf16 %v412_v48, %v411_v47  ;;  %v428_v53 = vld [vmem:[%s1423_s4 + $0x178] sm:$0xff]  ;;  %v395_v55 = vld [vmem:[%s1423_s4 + $0x70] sm:$0xff] }
  0x28   :  { %203 = vmatmul.mubr.f32.gmra.mrb[2].mxu0 %v1157_v62  ;;  %954 = vmatprep.subr.bf16.mxu1 %v953_v58  ;;  %v385_v62 = vld [vmem:[%s1423_s4 + $0x20] sm:$0xff]  ;;  %v941_v40 = vpack.c.bf16 %v410_v38, %v409_v37  ;;  %v977_v57 = vpack.c.bf16 %v428_v53, %v427_v49 }
  0x29   :  { %207 = vmatprep.mubr.f32.mxu0 %v63_v54  ;;  %924 = vmatpush3.bf16.msra.mxu0 %v923_v2  ;;  %v927_v7 = vpack.c.bf16 %v386_v6, %v385_v62 }
  0x2a   :  { %813 = vmatmul.mubr.f32.gmra.mrb[2].mxu1 %v80_v0  ;;  %926 = vmatprep.subr.bf16.mxu0 %v925_v3  ;;  %v641_v0 = vld [vmem:[%s1424_s2] ss:$0 sm:$0xff] }
  0x2b   :  { %956 = vmatpush3.bf16.msra.mxu1 %v953_v58  ;;  %v947_v58 = vpack.c.bf16 %v396_v56, %v395_v55  ;;  %v642_v3 = vld [vmem:[%s1425_s3] ss:$0 sm:$0xff] }
  0x2c   :  { %640 = vmatmul.mubr.msk.f32.gmra.mrb[4].mxu0 %vm1236_vm3, %v1202_v20  ;;  %958 = vmatprep.subr.bf16.mxu1 %v957_v4  ;;  %v406_v20 = vld [vmem:[%s1423_s4 + $0xc8] sm:$0xff] }
  0x2d   :  { %212 = vmatprep.mubr.f32.mxu0 %v65_v5  ;;  %928 = vmatpush3.bf16.msra.mxu0 %v927_v7  ;;  %v933_v21 = vpack.c.bf16 %v406_v20, %v405_v19 }
  0x2e   :  { %930 = vmatprep.subr.bf16.mxu0 %v929_v11 }
  0x2f   :  { %960 = vmatpush3.bf16.msra.mxu1 %v957_v4 }
  0x30   :  { %213 = vmatmul.mubr.f32.gmra.mrb[6].mxu0 %v40_v32  ;;  %962 = vmatprep.subr.bf16.mxu1 %v961_v17  ;;  %v424_v32 = vld [vmem:[%s1423_s4 + $0x158] sm:$0xff] }
  0x31   :  { %932 = vmatpush3.bf16.msra.mxu0 %v931_v18  ;;  %v969_v35 = vpack.c.bf16 %v424_v32, %v423_v30 }
  0x32   :  { %934 = vmatprep.subr.bf16.mxu0 %v933_v21 }
  0x33   :  { %964 = vmatpush3.bf16.msra.mxu1 %v961_v17 }
  0x34   :  { %966 = vmatprep.subr.bf16.mxu1 %v965_v25 }
  0x35   :  { %936 = vmatpush3.bf16.msra.mxu0 %v935_v27 }
  0x36   :  { %938 = vmatprep.subr.bf16.mxu0 %v937_v31 }
  0x37   :  { %968 = vmatpush3.bf16.msra.mxu1 %v965_v25 }
  0x38   :  { %970 = vmatprep.subr.bf16.mxu1 %v969_v35 }
  0x39   :  { %940 = vmatpush3.bf16.msra.mxu0 %v939_v36 }
  0x3a   :  { %942 = vmatprep.subr.bf16.mxu0 %v941_v40 }
  0x3b   :  { %972 = vmatpush3.bf16.msra.mxu1 %v969_v35 }
  0x3c   :  { %974 = vmatprep.subr.bf16.mxu1 %v973_v45 }
  0x3d   :  { %944 = vmatpush3.bf16.msra.mxu0 %v943_v46 }
  0x3e   :  { %946 = vmatprep.subr.bf16.mxu0 %v945_v50 }
  0x3f   :  { %976 = vmatpush3.bf16.msra.mxu1 %v973_v45 }
  0x40   :  { %978 = vmatprep.subr.bf16.mxu1 %v977_v57 }
  0x41   :  { %948 = vmatpush3.bf16.msra.mxu0 %v947_v58 }
  0x43   :  { %980 = vmatpush3.bf16.msra.mxu1 %v977_v57 }
  0xf7   :  { %v681_v59 = vpop.f32.mrb[0].mxu0 }
  0xf8   :  { %v682_v60 = vpop.f32.mrb[1].mxu0 }
  0xf9   :  { %v811_v61 = vpop.f32.mrb[0].mxu1  ;;  %v683_v63 = vadd.f32 %v682_v60, %v681_v59 }
  0xfa   :  { %v284_v54 = vpop.f32.mrb[1].mxu1 }
  0xfb   :  { %v285_v1 = vadd.f32 %v683_v63, %v284_v54  ;;  %v684_v2 = vpop.f32.mrb[2].mxu0 }
  0xfc   :  { %v685_v4 = vpop.f32.mrb[3].mxu0 }
  0xfd   :  { %v814_v5 = vpop.f32.mrb[2].mxu1  ;;  %v310_v62 = vmul.f32 %v641_v0, %v285_v1  ;;  %v686_v6 = vadd.f32 %v685_v4, %v684_v2 }
  0xfe   :  { %v294_v7 = vpop.f32.mrb[3].mxu1 }
  0xff   :  { %v321_v8 = vadd.f32 %v642_v3, %v310_v62  ;;  %v290_v9 = vadd.f32 %v811_v61, %v686_v6  ;;  %v687_v10 = vpop.f32.mrb[4].mxu0 }
 0x100   :  { %v688_v11 = vpop.f32.mrb[5].mxu0 }
 0x101   :  { %v325_v14 = vmax.f32 %v321_v8, 0.0  ;;  %v311_v15 = vmul.f32 %v641_v0, %v290_v9  ;;  %v689_v16 = vadd.f32 %v688_v11, %v687_v10 }
 0x103   :  { %v333_v17 = vrot.slane %v325_v14, 7  ;;  %v322_v18 = vadd.f32 %v642_v3, %v311_v15  ;;  %v295_v19 = vadd.f32 %v689_v16, %v294_v7  ;;  %v690_v20 = vpop.f32.mrb[6].mxu0  ;;  %v648_v7 = vld [vmem:[%s1427_s6] ss:$0 sm:$0xff] }
 0x104   :  { %v691_v21 = vpop.f32.mrb[7].mxu0 }
 0x105   :  { %v326_v22 = vmax.f32 %v322_v18, 0.0  ;;  %v312_v23 = vmul.f32 %v641_v0, %v295_v19  ;;  %v692_v24 = vadd.f32 %v691_v21, %v690_v20  ;;  %v345_v25 = vsel %vm34_vm0, 0.0, %v333_v17 }
 0x106   :  { %v353_v29 = vrot.slane %v345_v25, 1  ;;  %v367_v30 = vrot.slane %v345_v25, 2 }
 0x107   :  { %v334_v26 = vrot.slane %v326_v22, 7  ;;  %v323_v27 = vadd.f32 %v642_v3, %v312_v23  ;;  %v300_v28 = vadd.f32 %v814_v5, %v692_v24  ;;  %v647_v5 = vld [vmem:[%s1426_s5] ss:$0 sm:$0xff] }
 0x109   :  { %v347_v31 = vsel %vm34_vm0, %v334_v26, 0.0  ;;  %v327_v32 = vmax.f32 %v323_v27, 0.0  ;;  %v313_v33 = vmul.f32 %v641_v0, %v300_v28  ;;  %v335_v34 = vsel %vm34_vm0, %v333_v17, %v334_v26 }
 0x10a   :  { %v354_v35 = vrot.slane %v335_v34, 1  ;;  %v368_v36 = vrot.slane %v335_v34, 2  ;;  %v370_v37 = vrot.slane %v347_v31, 2  ;;  %v356_v38 = vrot.slane %v347_v31, 1 }
 0x10b   :  { %v336_v39 = vrot.slane %v327_v32, 7  ;;  %v324_v40 = vadd.f32 %v642_v3, %v313_v33 }
 0x10c   :  { %v355_v41 = vsel %vm55_vm1, %v353_v29, %v354_v35  ;;  %v369_v43 = vsel %vm70_vm2, %v367_v30, %v368_v36  ;;  %v371_v44 = vsel %vm70_vm2, %v368_v36, %v370_v37  ;;  %v357_v45 = vsel %vm55_vm1, %v354_v35, %v356_v38 }
 0x10d   :  { %v328_v46 = vmax.f32 %v324_v40, 0.0  ;;  %493 = vmatprep.mubr.f32.mxu0 %v355_v41  ;;  %847 = vmatprep.mubr.f32.mxu1 %v369_v43  ;;  %v346_v47 = vsel %vm34_vm0, 0.0, %v336_v39 }
 0x10e   :  { %644 = vmatmul.mubr.msk.f32.vlgmr.msra.gmra.mrb[8].mxu0 %vm1236_vm3, %v333_v17  ;;  %848 = vmatmul.mubr.f32.vlgmr.msra.gmra.mrb[4].mxu1 %v371_v44  ;;  %v358_v50 = vrot.slane %v346_v47, 1  ;;  %v372_v53 = vrot.slane %v346_v47, 2 }
 0x10f   :  { %v337_v48 = vrot.slane %v328_v46, 7  ;;  %498 = vmatprep.mubr.f32.mxu0 %v357_v45 }
 0x111   :  { %v338_v49 = vsel %vm34_vm0, %v336_v39, %v337_v48  ;;  %v348_v55 = vsel %vm34_vm0, %v337_v48, 0.0 }
 0x112   :  { %499 = vmatmul.mubr.f32.gmra.mrb[10].mxu0 %v335_v34  ;;  %v359_v56 = vrot.slane %v338_v49, 1  ;;  %v373_v57 = vrot.slane %v338_v49, 2  ;;  %v375_v58 = vrot.slane %v348_v55, 2  ;;  %v361_v59 = vrot.slane %v348_v55, 1 }
 0x114   :  { %v360_v60 = vsel %vm55_vm1, %v358_v50, %v359_v56  ;;  %v374_v61 = vsel %vm70_vm2, %v372_v53, %v373_v57  ;;  %v376_v63 = vsel %vm70_vm2, %v373_v57, %v375_v58  ;;  %v362_v54 = vsel %vm55_vm1, %v359_v56, %v361_v59 }
 0x115   :  { %503 = vmatprep.mubr.f32.mxu0 %v360_v60  ;;  %850 = vmatprep.mubr.f32.mxu1 %v374_v61 }
 0x116   :  { %646 = vmatmul.mubr.msk.f32.gmra.mrb[12].mxu0 %vm1236_vm3, %v336_v39  ;;  %851 = vmatmul.mubr.f32.gmra.mrb[6].mxu1 %v376_v63 }
 0x117   :  { %508 = vmatprep.mubr.f32.mxu0 %v362_v54 }
 0x11a   :  { %509 = vmatmul.mubr.f32.gmra.mrb[14].mxu0 %v338_v49 }
 0x1e1   :  { %v745_v0 = vpop.f32.mrb[8].mxu0  ;;  %v849_v1 = vpop.f32.mrb[4].mxu1 }
 0x1e2   :  { %v746_v2 = vpop.f32.mrb[9].mxu0  ;;  %v580_v3 = vpop.f32.mrb[5].mxu1 }
 0x1e3   :  { %v747_v4 = vadd.f32 %v746_v2, %v745_v0 }
 0x1e5   :  { %v581_v62 = vadd.f32 %v747_v4, %v580_v3  ;;  %v748_v6 = vpop.f32.mrb[10].mxu0 }
 0x1e6   :  { %v749_v42 = vpop.f32.mrb[11].mxu0 }
 0x1e7   :  { %v606_v8 = vmul.f32 %v647_v5, %v581_v62  ;;  %v750_v9 = vadd.f32 %v749_v42, %v748_v6 }
 0x1e9   :  { %v617_v10 = vadd.f32 %v648_v7, %v606_v8  ;;  %v586_v11 = vadd.f32 %v849_v1, %v750_v9  ;;  %v751_v14 = vpop.f32.mrb[12].mxu0  ;;  %v852_v15 = vpop.f32.mrb[6].mxu1 }
 0x1ea   :  { %v752_v16 = vpop.f32.mrb[13].mxu0  ;;  %v590_v17 = vpop.f32.mrb[7].mxu1 }
 0x1eb   :  { %v621_v18 = vadd.f32 %v617_v10, %v1132_v51  ;;  %v607_v19 = vmul.f32 %v647_v5, %v586_v11  ;;  %v753_v20 = vadd.f32 %v752_v16, %v751_v14 }
 0x1ed   :  { %v625_v21 = vmax.f32 %v621_v18, 0.0  ;;  %v618_v22 = vadd.f32 %v648_v7, %v607_v19  ;;  %v591_v23 = vadd.f32 %v753_v20, %v590_v17  ;;  %v754_v24 = vpop.f32.mrb[14].mxu0 }
 0x1ee   :  { %v755_v25 = vpop.f32.mrb[15].mxu0 }
 0x1ef   :  { %629 = vst [vmem:[%s1428_s7] sm:$0xff] %v625_v21  ;;  %v622_v26 = vadd.f32 %v618_v22, %v1137_v52  ;;  %v608_v27 = vmul.f32 %v647_v5, %v591_v23  ;;  %v756_v28 = vadd.f32 %v755_v25, %v754_v24 }
 0x1f1   :  { %v626_v29 = vmax.f32 %v622_v26, 0.0  ;;  %v619_v30 = vadd.f32 %v648_v7, %v608_v27  ;;  %v596_v31 = vadd.f32 %v852_v15, %v756_v28 }
 0x1f3   :  { %630 = vst [vmem:[%s1428_s7 + $0x8] sm:$0xff] %v626_v29  ;;  %v623_v51 = vadd.f32 %v619_v30, %v1182_v12  ;;  %v609_v32 = vmul.f32 %v647_v5, %v596_v31 }
 0x1f5   :  { %v627_v33 = vmax.f32 %v623_v51, 0.0  ;;  %v620_v34 = vadd.f32 %v648_v7, %v609_v32 }
 0x1f7   :  { %631 = vst [vmem:[%s1428_s7 + $0x10] sm:$0xff] %v627_v33  ;;  %v624_v52 = vadd.f32 %v620_v34, %v1187_v13 }
 0x1f9   :  { %v628_v35 = vmax.f32 %v624_v52, 0.0 }
 0x1fb   :  { %632 = vst [vmem:[%s1428_s7 + $0x18] sm:$0xff] %v628_v35 }

</bundles_post_ra>
